<compile_context>
chip_gen: v7x
topology: tpu7x:2x2x1
jax: 0.10.0
libtpu: 0.0.40
codegen_flags: <defaults>
</compile_context>

<pallas_src>
import math

import jax
import jax.numpy as jnp
from jax.experimental import pallas as pl
from jax.experimental.pallas import tpu as pltpu

BN_EPS = 1e-5


def gcn_class_simple_kernel(
    x_ref,      # (B, N*F)   batch-major flattened input for one graph
    k1_ref,     # (N*F, N*H) adjacency-folded gcin weight
    b1_ref,     # (1, N*H)   gcin bias tiled over nodes
    g1_ref,     # (1, N*H)   bnin gamma
    be1_ref,    # (1, N*H)   bnin beta
    k2_ref,     # (N*H, N*F) adjacency-folded gcout weight
    b2_ref,     # (1, N*F)   gcout bias tiled over nodes
    g2_ref,     # (1, N*F)   bnout gamma
    be2_ref,    # (1, N*F)   bnout beta
    wl_ref,     # (N*F, C)   Linear.weight.T
    bl_ref,     # (1, C)     Linear.bias
    out_ref,    # (B, C)
):
    inv_b = 1.0 / x_ref.shape[0]

    # ---- gcin: adjacency folded into the weight -> one lane-dense matmul ----
    y = jnp.dot(x_ref[...], k1_ref[...],
                preferred_element_type=jnp.float32) + b1_ref[...]     # (B, N*H)

    # ---- bnin: training-mode batch stats over B, fused affine --------------
    # NOTE: one-pass E[x^2] - E[x]^2 variance (clamped at 0); cheaper than the
    # two-pass centered form and accurate at these activation magnitudes.
    mean = jnp.sum(y, axis=0, keepdims=True) * inv_b
    var = jnp.maximum(jnp.sum(y * y, axis=0, keepdims=True) * inv_b
                      - mean * mean, 0.0)
    scale = g1_ref[...] * jax.lax.rsqrt(var + BN_EPS)
    shift = be1_ref[...] - mean * scale
    # ReLU.  TODO(synk): dropout (p=0.5, training mode) not reproduced;
    # implemented as eval-mode identity.
    y = jnp.maximum(y * scale + shift, 0.0)

    # ---- gcout ---------------------------------------------------------------
    y = jnp.dot(y, k2_ref[...],
                preferred_element_type=jnp.float32) + b2_ref[...]     # (B, N*F)

    # ---- bnout ---------------------------------------------------------------
    mean = jnp.sum(y, axis=0, keepdims=True) * inv_b
    var = jnp.maximum(jnp.sum(y * y, axis=0, keepdims=True) * inv_b
                      - mean * mean, 0.0)
    scale = g2_ref[...] * jax.lax.rsqrt(var + BN_EPS)
    shift = be2_ref[...] - mean * scale
    y = jnp.maximum(y * scale + shift, 0.0)

    # ---- Linear + LogSoftmax(dim=1) -----------------------------------------
    logits = jnp.dot(y, wl_ref[...],
                     preferred_element_type=jnp.float32) + bl_ref[...]  # (B, C)
    z = logits - jnp.max(logits, axis=1, keepdims=True)
    out_ref[...] = z - jnp.log(jnp.sum(jnp.exp(z), axis=1, keepdims=True))


def _fold_params(params, N, F, H, C):
    """Host-side layout prep: fold adjacency into weights (Kronecker) and
    flatten biases / BN params to batch-major (1, N*feat) rows."""
    k1 = jnp.einsum('nm,fh->mfnh', params['adj_in'],
                    params['w_in']).reshape(N * F, N * H)
    b1 = jnp.tile(params['b_in'], N).reshape(1, N * H)
    k2 = jnp.einsum('nm,hf->mhnf', params['adj_out'],
                    params['w_out']).reshape(N * H, N * F)
    b2 = jnp.tile(params['b_out'], N).reshape(1, N * F)
    return (k1, b1,
            params['g_in'].reshape(1, N * H), params['be_in'].reshape(1, N * H),
            k2, b2,
            params['g_out'].reshape(1, N * F), params['be_out'].reshape(1, N * F),
            params['w_lin'].T, params['b_lin'].reshape(1, C))


def gcn_class_simple_stacked(x, params):
    """Forward for G independent graphs stacked on a leading axis.

    x: (G, B, N, F) -> (G, B, C).  BatchNorm batch statistics are computed per
    graph over its own B (matches the module's b > 1 branch; requires B > 1).
    Weights stay VMEM-resident across the G grid steps.
    """
    G, B, N, F = x.shape
    H = params['w_in'].shape[1]
    C = params['w_lin'].shape[0]
    NF, NH = N * F, N * H

    x_flat = x.reshape(G, B, NF)                  # batch-major, cols = n*F + f
    weights = _fold_params(params, N, F, H, C)
    args = (x_flat,) + weights

    # Weights / BN params get constant index_maps -> fetched once, resident.
    const = lambda shape: pl.BlockSpec(shape, lambda g: (0,) * len(shape))
    in_specs = [pl.BlockSpec((None, B, NF), lambda g: (g, 0, 0))] + [
        const(tuple(w.shape)) for w in weights]
    out_specs = pl.BlockSpec((None, B, C), lambda g: (g, 0, 0))

    flops = G * (2 * B * NF * NH + 2 * B * NH * NF + 2 * B * NF * C)
    transcendentals = G * (NH + NF + B * C + B)   # rsqrt + exp + log
    bytes_accessed = 4 * (sum(int(a.size) for a in args) + G * B * C)
    cost = pl.CostEstimate(flops=flops, transcendentals=transcendentals,
                           bytes_accessed=bytes_accessed)

    return pl.pallas_call(
        gcn_class_simple_kernel,
        out_shape=jax.ShapeDtypeStruct((G, B, C), jnp.float32),
        grid=(G,),
        in_specs=in_specs,
        out_specs=out_specs,
        cost_estimate=cost,
        compiler_params=pltpu.CompilerParams(
            dimension_semantics=("parallel",)),
    )(*args)


def gcn_class_simple(x, params):
    """Single-graph forward (B, N, F) -> (B, C), mirroring the PyTorch module."""
    return gcn_class_simple_stacked(x[None], params)[0]


def reference(x, p):
    """Pure-JAX reference mirroring the PyTorch forward (eval-mode dropout)."""
    B, N, F = x.shape
    y = jnp.einsum('bnf,fh->bnh', x, p['w_in'])
    y = jnp.einsum('nm,bmh->bnh', p['adj_in'], y) + p['b_in']
    yf = y.reshape(B, -1)
    mean = yf.mean(0)
    var = ((yf - mean) ** 2).mean(0)
    yf = (yf - mean) / jnp.sqrt(var + BN_EPS) * p['g_in'] + p['be_in']
    y = jnp.maximum(yf.reshape(y.shape), 0.0)

    y = jnp.einsum('bnh,hf->bnf', y, p['w_out'])
    y = jnp.einsum('nm,bmf->bnf', p['adj_out'], y) + p['b_out']
    yf = y.reshape(B, -1)
    mean = yf.mean(0)
    var = ((yf - mean) ** 2).mean(0)
    yf = (yf - mean) / jnp.sqrt(var + BN_EPS) * p['g_out'] + p['be_out']
    y = jnp.maximum(yf, 0.0)

    logits = y @ p['w_lin'].T + p['b_lin']
    return jax.nn.log_softmax(logits, axis=1)


def init_params(key, N, F, H, C):
    ks = jax.random.split(key, 12)
    u = lambda k, shape, s: jax.random.uniform(k, shape, jnp.float32, -s, s)
    s_in = 1.0 / math.sqrt(H)        # gcin: stdv = 1/sqrt(out_features)
    s_out = 1.0 / math.sqrt(F)       # gcout
    s_lin = 1.0 / math.sqrt(N * F)   # Linear
    return {
        'w_in': u(ks[0], (F, H), s_in),
        'adj_in': u(ks[1], (N, N), s_in),
        'b_in': u(ks[2], (H,), s_in),
        # torch BatchNorm1d defaults are gamma=1 / beta=0; perturb slightly so
        # the test exercises the flattened (node*feat) ordering of BN params.
        'g_in': 1.0 + 0.1 * u(ks[3], (N * H,), 1.0),
        'be_in': 0.1 * u(ks[4], (N * H,), 1.0),
        'w_out': u(ks[5], (H, F), s_out),
        'adj_out': u(ks[6], (N, N), s_out),
        'b_out': u(ks[7], (F,), s_out),
        'g_out': 1.0 + 0.1 * u(ks[8], (N * F,), 1.0),
        'be_out': 0.1 * u(ks[9], (N * F,), 1.0),
        'w_lin': u(ks[10], (C, N * F), s_lin),   # torch Linear weight (out, in)
        'b_lin': u(ks[11], (C,), s_lin),
    }


if __name__ == "__main__":
    # batch, graph nodes, input features, hidden features, classes.
    # N*F = 128 and N*H = 256 -> fully lane-dense folded matmuls.
    B, N, F, H, C = 4, 8, 16, 32, 12
    key = jax.random.PRNGKey(0)
    kx, kp, kg = jax.random.split(key, 3)
    x = jax.random.normal(kx, (B, N, F), jnp.float32)
    params = init_params(kp, N, F, H, C)

    # Single-graph forward (mirrors the PyTorch module).
    out = jax.block_until_ready(gcn_class_simple(x, params))
    ref = reference(x, params)
    assert out.shape == (B, C)
    assert jnp.allclose(out, ref, rtol=1e-4, atol=1e-4), (out, ref)

    # Stacked-graphs path: G graphs in one pallas_call, resident weights,
    # parallel graph axis (feeds v7x's second TensorCore).
    G = 3
    xs = jax.random.normal(kg, (G, B, N, F), jnp.float32)
    outs = jax.block_until_ready(gcn_class_simple_stacked(xs, params))
    refs = jnp.stack([reference(xs[g], params) for g in range(G)])
    assert outs.shape == (G, B, C)
    assert jnp.allclose(outs, refs, rtol=1e-4, atol=1e-4), (outs, refs)

    print("KERNEL_OK")
</pallas_src>

<mosaic_0001>
module attributes {stable_mosaic.version = 11 : i64} {
  func.func @gcn_class_simple_kernel(%arg0: i32, %arg1: memref<1x4x128xf32, #tpu.memory_space<vmem>>, %arg2: memref<128x256xf32, #tpu.memory_space<vmem>>, %arg3: memref<1x256xf32, #tpu.memory_space<vmem>>, %arg4: memref<1x256xf32, #tpu.memory_space<vmem>>, %arg5: memref<1x256xf32, #tpu.memory_space<vmem>>, %arg6: memref<256x128xf32, #tpu.memory_space<vmem>>, %arg7: memref<1x128xf32, #tpu.memory_space<vmem>>, %arg8: memref<1x128xf32, #tpu.memory_space<vmem>>, %arg9: memref<1x128xf32, #tpu.memory_space<vmem>>, %arg10: memref<128x12xf32, #tpu.memory_space<vmem>>, %arg11: memref<1x12xf32, #tpu.memory_space<vmem>>, %arg12: memref<1x4x12xf32, #tpu.memory_space<vmem>>) attributes {dimension_semantics = [#tpu.dimension_semantics<parallel>], iteration_bounds = array<i64: 1>, scalar_prefetch = 0 : i64, scratch_operands = 0 : i64, tpu.core_type = #tpu.core_type<tc>, window_params = [{transform_indices = @transform_0, window_bounds = array<i64: 1, 4, 128>}, {pipeline_mode = #tpu.pipeline_mode<synchronous>, transform_indices = @transform_1, window_bounds = array<i64: 128, 256>}, {pipeline_mode = #tpu.pipeline_mode<synchronous>, transform_indices = @transform_2, window_bounds = array<i64: 1, 256>}, {pipeline_mode = #tpu.pipeline_mode<synchronous>, transform_indices = @transform_3, window_bounds = array<i64: 1, 256>}, {pipeline_mode = #tpu.pipeline_mode<synchronous>, transform_indices = @transform_4, window_bounds = array<i64: 1, 256>}, {pipeline_mode = #tpu.pipeline_mode<synchronous>, transform_indices = @transform_5, window_bounds = array<i64: 256, 128>}, {pipeline_mode = #tpu.pipeline_mode<synchronous>, transform_indices = @transform_6, window_bounds = array<i64: 1, 128>}, {pipeline_mode = #tpu.pipeline_mode<synchronous>, transform_indices = @transform_7, window_bounds = array<i64: 1, 128>}, {pipeline_mode = #tpu.pipeline_mode<synchronous>, transform_indices = @transform_8, window_bounds = array<i64: 1, 128>}, {pipeline_mode = #tpu.pipeline_mode<synchronous>, transform_indices = @transform_9, window_bounds = array<i64: 128, 12>}, {pipeline_mode = #tpu.pipeline_mode<synchronous>, transform_indices = @transform_10, window_bounds = array<i64: 1, 12>}, {transform_indices = @transform_11, window_bounds = array<i64: 1, 4, 12>}]} {
    %c0 = arith.constant 0 : index
    %c0_0 = arith.constant 0 : index
    %c0_1 = arith.constant 0 : index
    %0 = vector.load %arg1[%c0, %c0_0, %c0_1] : memref<1x4x128xf32, #tpu.memory_space<vmem>>, vector<1x4x128xf32>
    %1 = vector.shape_cast %0 : vector<1x4x128xf32> to vector<4x128xf32>
    %c0_2 = arith.constant 0 : index
    %c0_3 = arith.constant 0 : index
    %2 = vector.load %arg2[%c0_2, %c0_3] : memref<128x256xf32, #tpu.memory_space<vmem>>, vector<128x256xf32>
    %cst = arith.constant dense<0.000000e+00> : vector<4x256xf32>
    %3 = tpu.matmul %1, %2, %cst {dimension_numbers = #tpu.dot_dimension_numbers<[1], [0], [0], [1], [0, 0, 1, 1], [], []>} : vector<4x128xf32>, vector<128x256xf32>, vector<4x256xf32> -> vector<4x256xf32>
    %c0_4 = arith.constant 0 : index
    %c0_5 = arith.constant 0 : index
    %4 = vector.load %arg3[%c0_4, %c0_5] : memref<1x256xf32, #tpu.memory_space<vmem>>, vector<1x256xf32>
    %5 = vector.broadcast %4 : vector<1x256xf32> to vector<4x256xf32>
    %6 = arith.addf %3, %5 : vector<4x256xf32>
    %cst_6 = arith.constant dense<0.000000e+00> : vector<256xf32>
    %7 = vector.multi_reduction <add>, %6, %cst_6 [0] : vector<4x256xf32> to vector<256xf32>
    %8 = vector.shape_cast %7 : vector<256xf32> to vector<1x256xf32>
    %cst_7 = arith.constant 2.500000e-01 : f32
    %9 = vector.broadcast %cst_7 : f32 to vector<1x256xf32>
    %10 = arith.mulf %8, %9 : vector<1x256xf32>
    %11 = arith.mulf %6, %6 : vector<4x256xf32>
    %cst_8 = arith.constant dense<0.000000e+00> : vector<256xf32>
    %12 = vector.multi_reduction <add>, %11, %cst_8 [0] : vector<4x256xf32> to vector<256xf32>
    %13 = vector.shape_cast %12 : vector<256xf32> to vector<1x256xf32>
    %cst_9 = arith.constant 2.500000e-01 : f32
    %14 = vector.broadcast %cst_9 : f32 to vector<1x256xf32>
    %15 = arith.mulf %13, %14 : vector<1x256xf32>
    %16 = arith.mulf %10, %10 : vector<1x256xf32>
    %17 = arith.subf %15, %16 : vector<1x256xf32>
    %cst_10 = arith.constant 0.000000e+00 : f32
    %18 = vector.broadcast %cst_10 : f32 to vector<1x256xf32>
    %19 = arith.maximumf %17, %18 : vector<1x256xf32>
    %c0_11 = arith.constant 0 : index
    %c0_12 = arith.constant 0 : index
    %20 = vector.load %arg4[%c0_11, %c0_12] : memref<1x256xf32, #tpu.memory_space<vmem>>, vector<1x256xf32>
    %cst_13 = arith.constant 9.99999974E-6 : f32
    %21 = vector.broadcast %cst_13 : f32 to vector<1x256xf32>
    %22 = arith.addf %19, %21 : vector<1x256xf32>
    %23 = math.rsqrt %22 : vector<1x256xf32>
    %24 = arith.mulf %20, %23 : vector<1x256xf32>
    %c0_14 = arith.constant 0 : index
    %c0_15 = arith.constant 0 : index
    %25 = vector.load %arg5[%c0_14, %c0_15] : memref<1x256xf32, #tpu.memory_space<vmem>>, vector<1x256xf32>
    %26 = arith.mulf %10, %24 : vector<1x256xf32>
    %27 = arith.subf %25, %26 : vector<1x256xf32>
    %28 = vector.broadcast %24 : vector<1x256xf32> to vector<4x256xf32>
    %29 = arith.mulf %6, %28 : vector<4x256xf32>
    %30 = vector.broadcast %27 : vector<1x256xf32> to vector<4x256xf32>
    %31 = arith.addf %29, %30 : vector<4x256xf32>
    %cst_16 = arith.constant 0.000000e+00 : f32
    %32 = vector.broadcast %cst_16 : f32 to vector<4x256xf32>
    %33 = arith.maximumf %31, %32 : vector<4x256xf32>
    %c0_17 = arith.constant 0 : index
    %c0_18 = arith.constant 0 : index
    %34 = vector.load %arg6[%c0_17, %c0_18] : memref<256x128xf32, #tpu.memory_space<vmem>>, vector<256x128xf32>
    %cst_19 = arith.constant dense<0.000000e+00> : vector<4x128xf32>
    %35 = tpu.matmul %33, %34, %cst_19 {dimension_numbers = #tpu.dot_dimension_numbers<[1], [0], [0], [1], [0, 0, 1, 1], [], []>} : vector<4x256xf32>, vector<256x128xf32>, vector<4x128xf32> -> vector<4x128xf32>
    %c0_20 = arith.constant 0 : index
    %c0_21 = arith.constant 0 : index
    %36 = vector.load %arg7[%c0_20, %c0_21] : memref<1x128xf32, #tpu.memory_space<vmem>>, vector<1x128xf32>
    %37 = vector.broadcast %36 : vector<1x128xf32> to vector<4x128xf32>
    %38 = arith.addf %35, %37 : vector<4x128xf32>
    %cst_22 = arith.constant dense<0.000000e+00> : vector<128xf32>
    %39 = vector.multi_reduction <add>, %38, %cst_22 [0] : vector<4x128xf32> to vector<128xf32>
    %40 = vector.shape_cast %39 : vector<128xf32> to vector<1x128xf32>
    %cst_23 = arith.constant 2.500000e-01 : f32
    %41 = vector.broadcast %cst_23 : f32 to vector<1x128xf32>
    %42 = arith.mulf %40, %41 : vector<1x128xf32>
    %43 = arith.mulf %38, %38 : vector<4x128xf32>
    %cst_24 = arith.constant dense<0.000000e+00> : vector<128xf32>
    %44 = vector.multi_reduction <add>, %43, %cst_24 [0] : vector<4x128xf32> to vector<128xf32>
    %45 = vector.shape_cast %44 : vector<128xf32> to vector<1x128xf32>
    %cst_25 = arith.constant 2.500000e-01 : f32
    %46 = vector.broadcast %cst_25 : f32 to vector<1x128xf32>
    %47 = arith.mulf %45, %46 : vector<1x128xf32>
    %48 = arith.mulf %42, %42 : vector<1x128xf32>
    %49 = arith.subf %47, %48 : vector<1x128xf32>
    %cst_26 = arith.constant 0.000000e+00 : f32
    %50 = vector.broadcast %cst_26 : f32 to vector<1x128xf32>
    %51 = arith.maximumf %49, %50 : vector<1x128xf32>
    %c0_27 = arith.constant 0 : index
    %c0_28 = arith.constant 0 : index
    %52 = vector.load %arg8[%c0_27, %c0_28] : memref<1x128xf32, #tpu.memory_space<vmem>>, vector<1x128xf32>
    %cst_29 = arith.constant 9.99999974E-6 : f32
    %53 = vector.broadcast %cst_29 : f32 to vector<1x128xf32>
    %54 = arith.addf %51, %53 : vector<1x128xf32>
    %55 = math.rsqrt %54 : vector<1x128xf32>
    %56 = arith.mulf %52, %55 : vector<1x128xf32>
    %c0_30 = arith.constant 0 : index
    %c0_31 = arith.constant 0 : index
    %57 = vector.load %arg9[%c0_30, %c0_31] : memref<1x128xf32, #tpu.memory_space<vmem>>, vector<1x128xf32>
    %58 = arith.mulf %42, %56 : vector<1x128xf32>
    %59 = arith.subf %57, %58 : vector<1x128xf32>
    %60 = vector.broadcast %56 : vector<1x128xf32> to vector<4x128xf32>
    %61 = arith.mulf %38, %60 : vector<4x128xf32>
    %62 = vector.broadcast %59 : vector<1x128xf32> to vector<4x128xf32>
    %63 = arith.addf %61, %62 : vector<4x128xf32>
    %cst_32 = arith.constant 0.000000e+00 : f32
    %64 = vector.broadcast %cst_32 : f32 to vector<4x128xf32>
    %65 = arith.maximumf %63, %64 : vector<4x128xf32>
    %c0_33 = arith.constant 0 : index
    %c0_34 = arith.constant 0 : index
    %66 = vector.load %arg10[%c0_33, %c0_34] : memref<128x12xf32, #tpu.memory_space<vmem>>, vector<128x12xf32>
    %cst_35 = arith.constant dense<0.000000e+00> : vector<4x12xf32>
    %67 = tpu.matmul %65, %66, %cst_35 {dimension_numbers = #tpu.dot_dimension_numbers<[1], [0], [0], [1], [0, 0, 1, 1], [], []>} : vector<4x128xf32>, vector<128x12xf32>, vector<4x12xf32> -> vector<4x12xf32>
    %c0_36 = arith.constant 0 : index
    %c0_37 = arith.constant 0 : index
    %68 = vector.load %arg11[%c0_36, %c0_37] : memref<1x12xf32, #tpu.memory_space<vmem>>, vector<1x12xf32>
    %69 = vector.broadcast %68 : vector<1x12xf32> to vector<4x12xf32>
    %70 = arith.addf %67, %69 : vector<4x12xf32>
    %cst_38 = arith.constant dense<0xFF800000> : vector<4xf32>
    %71 = vector.multi_reduction <maximumf>, %70, %cst_38 [1] : vector<4x12xf32> to vector<4xf32>
    %72 = vector.shape_cast %71 : vector<4xf32> to vector<4x1xf32>
    %73 = vector.broadcast %72 : vector<4x1xf32> to vector<4x12xf32>
    %74 = arith.subf %70, %73 : vector<4x12xf32>
    %75 = math.exp %74 : vector<4x12xf32>
    %cst_39 = arith.constant dense<0.000000e+00> : vector<4xf32>
    %76 = vector.multi_reduction <add>, %75, %cst_39 [1] : vector<4x12xf32> to vector<4xf32>
    %77 = vector.shape_cast %76 : vector<4xf32> to vector<4x1xf32>
    %78 = math.log %77 : vector<4x1xf32>
    %79 = vector.broadcast %78 : vector<4x1xf32> to vector<4x12xf32>
    %80 = arith.subf %74, %79 : vector<4x12xf32>
    %c0_40 = arith.constant 0 : index
    %c0_41 = arith.constant 0 : index
    %c0_42 = arith.constant 0 : index
    %81 = vector.load %arg12[%c0_40, %c0_41, %c0_42] : memref<1x4x12xf32, #tpu.memory_space<vmem>>, vector<1x4x12xf32>
    %82 = vector.shape_cast %81 : vector<1x4x12xf32> to vector<4x12xf32>
    %83 = vector.shape_cast %80 : vector<4x12xf32> to vector<1x4x12xf32>
    tpu.vector_store %arg12[%c0_40, %c0_41, %c0_42], %83 {strides = array<i32>} : memref<1x4x12xf32, #tpu.memory_space<vmem>>, vector<1x4x12xf32>,
    return
  }
  func.func @transform_0(%arg0: i32) -> (i32, i32, i32) {
    %c0_i32 = arith.constant 0 : i32
    %c0_i32_0 = arith.constant 0 : i32
    %c0_i32_1 = arith.constant 0 : i32
    return %arg0, %c0_i32, %c0_i32_0 : i32, i32, i32
  }
  func.func @transform_1(%arg0: i32) -> (i32, i32) {
    %c0_i32 = arith.constant 0 : i32
    %c0_i32_0 = arith.constant 0 : i32
    %c0_i32_1 = arith.constant 0 : i32
    return %c0_i32, %c0_i32_0 : i32, i32
  }
  func.func @transform_2(%arg0: i32) -> (i32, i32) {
    %c0_i32 = arith.constant 0 : i32
    %c0_i32_0 = arith.constant 0 : i32
    %c0_i32_1 = arith.constant 0 : i32
    return %c0_i32, %c0_i32_0 : i32, i32
  }
  func.func @transform_3(%arg0: i32) -> (i32, i32) {
    %c0_i32 = arith.constant 0 : i32
    %c0_i32_0 = arith.constant 0 : i32
    %c0_i32_1 = arith.constant 0 : i32
    return %c0_i32, %c0_i32_0 : i32, i32
  }
  func.func @transform_4(%arg0: i32) -> (i32, i32) {
    %c0_i32 = arith.constant 0 : i32
    %c0_i32_0 = arith.constant 0 : i32
    %c0_i32_1 = arith.constant 0 : i32
    return %c0_i32, %c0_i32_0 : i32, i32
  }
  func.func @transform_5(%arg0: i32) -> (i32, i32) {
    %c0_i32 = arith.constant 0 : i32
    %c0_i32_0 = arith.constant 0 : i32
    %c0_i32_1 = arith.constant 0 : i32
    return %c0_i32, %c0_i32_0 : i32, i32
  }
  func.func @transform_6(%arg0: i32) -> (i32, i32) {
    %c0_i32 = arith.constant 0 : i32
    %c0_i32_0 = arith.constant 0 : i32
    %c0_i32_1 = arith.constant 0 : i32
    return %c0_i32, %c0_i32_0 : i32, i32
  }
  func.func @transform_7(%arg0: i32) -> (i32, i32) {
    %c0_i32 = arith.constant 0 : i32
    %c0_i32_0 = arith.constant 0 : i32
    %c0_i32_1 = arith.constant 0 : i32
    return %c0_i32, %c0_i32_0 : i32, i32
  }
  func.func @transform_8(%arg0: i32) -> (i32, i32) {
    %c0_i32 = arith.constant 0 : i32
    %c0_i32_0 = arith.constant 0 : i32
    %c0_i32_1 = arith.constant 0 : i32
    return %c0_i32, %c0_i32_0 : i32, i32
  }
  func.func @transform_9(%arg0: i32) -> (i32, i32) {
    %c0_i32 = arith.constant 0 : i32
    %c0_i32_0 = arith.constant 0 : i32
    %c0_i32_1 = arith.constant 0 : i32
    return %c0_i32, %c0_i32_0 : i32, i32
  }
  func.func @transform_10(%arg0: i32) -> (i32, i32) {
    %c0_i32 = arith.constant 0 : i32
    %c0_i32_0 = arith.constant 0 : i32
    %c0_i32_1 = arith.constant 0 : i32
    return %c0_i32, %c0_i32_0 : i32, i32
  }
  func.func @transform_11(%arg0: i32) -> (i32, i32, i32) {
    %c0_i32 = arith.constant 0 : i32
    %c0_i32_0 = arith.constant 0 : i32
    %c0_i32_1 = arith.constant 0 : i32
    return %arg0, %c0_i32, %c0_i32_0 : i32, i32, i32
  }
}

</mosaic_0001>

<bundles_post_ra>
// kernel: tpu_custom_call.1
= control target key start
LH: loop header
LB: loop body
LE: loop exit
PB: predicated region body
PF: predicated region fallthrough
CT: control target
= control target key end

     0   :  { %16 = vsyncpa [#allocation3], 0  ;;  %s1050_s0 = inlined_call_operand.vmem [shape: f32[1,4,128], index: 0, kind: input, shape index: {}]   ;;  %s1051_s1 = inlined_call_operand.hbm [shape: f32[128,256], index: 1, kind: input, shape index: {}]   ;;  %s1052_s2 = inlined_call_operand.vmem [shape: f32[1,256], index: 2, kind: input, shape index: {}]   ;;  %s1053_s3 = inlined_call_operand.vmem [shape: f32[1,256], index: 3, kind: input, shape index: {}]   ;;  %s1054_s4 = inlined_call_operand.vmem [shape: f32[1,256], index: 4, kind: input, shape index: {}]   ;;  %s1055_s5 = inlined_call_operand.hbm [shape: f32[256,128], index: 5, kind: input, shape index: {}]   ;;  %s1056_s6 = inlined_call_operand.vmem [shape: f32[1,128], index: 6, kind: input, shape index: {}]   ;;  %s1057_s7 = inlined_call_operand.vmem [shape: f32[1,128], index: 7, kind: input, shape index: {}]   ;;  %s1058_s8 = inlined_call_operand.vmem [shape: f32[1,128], index: 8, kind: input, shape index: {}]   ;;  %s1059_s9 = inlined_call_operand.vmem [shape: f32[128,12], index: 9, kind: input, shape index: {}]   ;;  %s1060_s10 = inlined_call_operand.vmem [shape: f32[1,12], index: 10, kind: input, shape index: {}]   ;;  %s1061_s11 = inlined_call_operand.hbm [shape: f32[1,4,12], index: 11, kind: output, shape index: {}]  }
   0x1   :  { %17 = vsyncpa [#allocation6], 0 }
   0x2   :  { %18 = vsyncpa [#allocation4], 0  ;;  %s842_s17 = smov [#allocation2]   ;;  %s770_s21 = scalar_lea.hbm %s1051_s1, 4096 }
   0x3   :  { %s26_s18 = sshll.u32 %s842_s17, 4  ;;  %p771_p0 = scmp.ne.s32.totalorder %s1051_s1, %s770_s21  ;;  %s27_s18 = int_to_ptr.vmem [resolvable:$true] %s26_s18 }
   0x4   :  { %p774_p1 = scmp.lt.u32.totalorder %s770_s21, %s1051_s1 }
   0x6   :  { %p776_p2 = pnand %p774_p1, %p771_p0 }
   0x8   :  { %779 = shalt.err (!%p776_p2)
}
   0x9   :  { %s780_s26 = scalar_lea.vmem %s27_s18, 4096  ;;  %p785_p4 = scmp.lt.s32.totalorder %s27_s18, %s27_s18 }
   0xa   :  { %p781_p3 = scmp.ne.s32.totalorder %s27_s18, %s780_s26  ;;  %p786_p5 = scmp.lt.s32.totalorder %s780_s26, %s780_s26 }
   0xc   :  { %p787_p6 = por %p786_p5, %p785_p4 }
   0xe   :  { %p788_p7 = pnand %p787_p6, %p781_p3 }
  0x10   :  { %791 = shalt.err (!%p788_p7)
}
  0x11   :  { %s843_s27 = smov 256   ;;  %s844_s28 = smov 16  }
  0x12   :  { %32 = dma.hbm_to_vmem [thread:$0]  %s1051_s1, 4096, %s27_s18, [#allocation3], %s843_s27, %s843_s27, %s844_s28  }
  0x13   :  { %s845_s12 = smov [#allocation5]   ;;  %s792_s16 = scalar_lea.hbm %s1055_s5, 4096 }
  0x14   :  { %s44_s13 = sshll.u32 %s845_s12, 4  ;;  %p793_p8 = scmp.ne.s32.totalorder %s1055_s5, %s792_s16  ;;  %s45_s13 = int_to_ptr.vmem [resolvable:$true] %s44_s13 }
  0x15   :  { %p796_p9 = scmp.lt.u32.totalorder %s792_s16, %s1055_s5 }
  0x17   :  { %p798_p10 = pnand %p796_p9, %p793_p8 }
  0x19   :  { %801 = shalt.err (!%p798_p10)
}
  0x1a   :  { %s802_s22 = scalar_lea.vmem %s45_s13, 4096  ;;  %p807_p12 = scmp.lt.s32.totalorder %s45_s13, %s45_s13 }
  0x1b   :  { %p803_p11 = scmp.ne.s32.totalorder %s45_s13, %s802_s22  ;;  %p808_p13 = scmp.lt.s32.totalorder %s802_s22, %s802_s22 }
  0x1d   :  { %p809_p0 = por %p808_p13, %p807_p12 }
  0x1f   :  { %p810_p1 = pnand %p809_p0, %p803_p11 }
  0x21   :  { %813 = shalt.err (!%p810_p1)
}
  0x22   :  { %s846_s1 = smov 128   ;;  %s847_s18 = smov 8  }
  0x23   :  { %50 = dma.hbm_to_vmem [thread:$0]  %s1055_s5, 4096, %s45_s13, [#allocation6], %s846_s1, %s846_s1, %s847_s18  }
  0x24   :  { %836 = dma.done.wait [#allocation3], 4096  }
  0x25   :  { %837 = vsyncadd [#allocation3], 4294963200 }
  0x26   :  { %838 = dma.done.wait [#allocation6], 4096  }
  0x27   :  { %839 = vsyncadd [#allocation6], 4294963200  ;;  %v848_v0 = vmov 0.0   ;;  %v69_v1 = vld [vmem:[#allocation2 + $0x8] sm:$0xff]  ;;  %v71_v2 = vld [vmem:[#allocation2 + $0x18] sm:$0xff]  ;;  %vm183_vm0 = vcmask 1043456  }
  0x28   :  { %176 = vmatprep.mubr.f32.mxu0 %v848_v0  ;;  %v68_v3 = vld [vmem:[#allocation2] sm:$0xff]  ;;  %v661_v4 = vpack.c.bf16 %v71_v2, %v69_v1  ;;  %v70_v5 = vld [vmem:[#allocation2 + $0x10] sm:$0xff]  ;;  %v73_v6 = vld [vmem:[#allocation2 + $0x28] sm:$0xff]  ;;  %vm851_vm1 = vmmov 0   ;;  %vm542_vm2 = vcmask 93184  }
  0x29   :  { %v75_v7 = vld [vmem:[#allocation2 + $0x38] sm:$0xff]  ;;  %v663_v8 = vpack.c.bf16 %v70_v5, %v68_v3  ;;  %v72_v10 = vld [vmem:[#allocation2 + $0x20] sm:$0xff]  ;;  %v74_v11 = vld [vmem:[#allocation2 + $0x30] sm:$0xff] }
  0x2a   :  { %v665_v9 = vpack.c.bf16 %v75_v7, %v73_v6  ;;  %v77_v12 = vld [vmem:[#allocation2 + $0x48] sm:$0xff]  ;;  %662 = vmatprep.subr.bf16.mxu0 %v661_v4  ;;  %v79_v13 = vld [vmem:[#allocation2 + $0x58] sm:$0xff]  ;;  %v667_v14 = vpack.c.bf16 %v74_v11, %v72_v10  ;;  %v76_v16 = vld [vmem:[#allocation2 + $0x40] sm:$0xff] }
  0x2b   :  { %664 = vmatpush1.bf16.msra.mxu0 %v663_v8  ;;  %v669_v15 = vpack.c.bf16 %v79_v13, %v77_v12  ;;  %v78_v17 = vld [vmem:[#allocation2 + $0x50] sm:$0xff]  ;;  %v81_v18 = vld [vmem:[#allocation2 + $0x68] sm:$0xff]  ;;  %v83_v19 = vld [vmem:[#allocation2 + $0x78] sm:$0xff] }
  0x2c   :  { %666 = vmatprep.subr.bf16.mxu0 %v665_v9  ;;  %v671_v20 = vpack.c.bf16 %v78_v17, %v76_v16  ;;  %v673_v21 = vpack.c.bf16 %v83_v19, %v81_v18  ;;  %v80_v22 = vld [vmem:[#allocation2 + $0x60] sm:$0xff]  ;;  %v82_v23 = vld [vmem:[#allocation2 + $0x70] sm:$0xff]  ;;  %v85_v24 = vld [vmem:[#allocation2 + $0x88] sm:$0xff] }
  0x2d   :  { %v87_v25 = vld [vmem:[#allocation2 + $0x98] sm:$0xff]  ;;  %v675_v26 = vpack.c.bf16 %v82_v23, %v80_v22  ;;  %v84_v28 = vld [vmem:[#allocation2 + $0x80] sm:$0xff]  ;;  %v86_v29 = vld [vmem:[#allocation2 + $0x90] sm:$0xff] }
  0x2e   :  { %v677_v27 = vpack.c.bf16 %v87_v25, %v85_v24  ;;  %v89_v30 = vld [vmem:[#allocation2 + $0xa8] sm:$0xff]  ;;  %v91_v31 = vld [vmem:[#allocation2 + $0xb8] sm:$0xff]  ;;  %v679_v32 = vpack.c.bf16 %v86_v29, %v84_v28  ;;  %v88_v34 = vld [vmem:[#allocation2 + $0xa0] sm:$0xff] }
  0x2f   :  { %668 = vmatpush1.bf16.msra.mxu0 %v667_v14  ;;  %v681_v33 = vpack.c.bf16 %v91_v31, %v89_v30  ;;  %v90_v35 = vld [vmem:[#allocation2 + $0xb0] sm:$0xff]  ;;  %v93_v36 = vld [vmem:[#allocation2 + $0xc8] sm:$0xff]  ;;  %v95_v37 = vld [vmem:[#allocation2 + $0xd8] sm:$0xff] }
  0x30   :  { %670 = vmatprep.subr.bf16.mxu0 %v669_v15  ;;  %v683_v38 = vpack.c.bf16 %v90_v35, %v88_v34  ;;  %v685_v39 = vpack.c.bf16 %v95_v37, %v93_v36  ;;  %v92_v40 = vld [vmem:[#allocation2 + $0xc0] sm:$0xff]  ;;  %v94_v41 = vld [vmem:[#allocation2 + $0xd0] sm:$0xff]  ;;  %v97_v42 = vld [vmem:[#allocation2 + $0xe8] sm:$0xff]  ;;  %v102_v35 = vlaneseq }
  0x31   :  { %v99_v43 = vld [vmem:[#allocation2 + $0xf8] sm:$0xff]  ;;  %v687_v44 = vpack.c.bf16 %v94_v41, %v92_v40  ;;  %v96_v46 = vld [vmem:[#allocation2 + $0xe0] sm:$0xff]  ;;  %v98_v47 = vld [vmem:[#allocation2 + $0xf0] sm:$0xff] }
  0x32   :  { %v689_v45 = vpack.c.bf16 %v99_v43, %v97_v42  ;;  %v691_v48 = vpack.c.bf16 %v98_v47, %v96_v46  ;;  %v67_v49 = vld [vmem:[%s1050_s0] sm:$0xf]  ;;  %v315_v51 = vld [vmem:[#allocation5 + $0x88] sm:$0xff]  ;;  %v316_v55 = vld [vmem:[#allocation5 + $0x90] sm:$0xff]  ;;  %v103_v36 = vshrl.u32 %v102_v35, 7 }
  0x33   :  { %672 = vmatpush1.bf16.msra.mxu0 %v671_v20  ;;  %v314_v50 = vld [vmem:[#allocation5 + $0x80] sm:$0xff]  ;;  %v299_v54 = vld [vmem:[#allocation5 + $0x8] sm:$0xff]  ;;  %v317_v56 = vld [vmem:[#allocation5 + $0x98] sm:$0xff] }
  0x34   :  { %674 = vmatprep.subr.bf16.mxu0 %v673_v21  ;;  %v298_v52 = vld [vmem:[#allocation5] sm:$0xff]  ;;  %v693_v53 = vpack.c.bf16 %v315_v51, %v314_v50  ;;  %v697_v58 = vpack.c.bf16 %v317_v56, %v316_v55  ;;  %v300_v59 = vld [vmem:[#allocation5 + $0x10] sm:$0xff]  ;;  %v301_v60 = vld [vmem:[#allocation5 + $0x18] sm:$0xff]  ;;  %v941_v37 = vsub.s32 0, %v103_v36 }
  0x35   :  { %v695_v57 = vpack.c.bf16 %v299_v54, %v298_v52  ;;  %v318_v61 = vld [vmem:[#allocation5 + $0xa0] sm:$0xff]  ;;  %v319_v62 = vld [vmem:[#allocation5 + $0xa8] sm:$0xff]  ;;  %v699_v63 = vpack.c.bf16 %v301_v60, %v300_v59  ;;  %v320_v4 = vld [vmem:[#allocation5 + $0xb0] sm:$0xff] }
  0x36   :  { %694 = vmatprep.subr.bf16.mxu1 %v693_v53  ;;  %v701_v1 = vpack.c.bf16 %v319_v62, %v318_v61  ;;  %v302_v2 = vld [vmem:[#allocation5 + $0x20] sm:$0xff]  ;;  %v303_v3 = vld [vmem:[#allocation5 + $0x28] sm:$0xff]  ;;  %v321_v5 = vld [vmem:[#allocation5 + $0xb8] sm:$0xff] }
  0x37   :  { %676 = vmatpush1.bf16.msra.mxu0 %v675_v26  ;;  %696 = vmatpush3.bf16.msra.mxu1 %v695_v57  ;;  %v703_v6 = vpack.c.bf16 %v303_v3, %v302_v2  ;;  %v705_v7 = vpack.c.bf16 %v321_v5, %v320_v4  ;;  %v304_v8 = vld [vmem:[#allocation5 + $0x30] sm:$0xff]  ;;  %v305_v9 = vld [vmem:[#allocation5 + $0x38] sm:$0xff]  ;;  %v322_v10 = vld [vmem:[#allocation5 + $0xc0] sm:$0xff] }
  0x38   :  { %678 = vmatprep.subr.bf16.mxu0 %v677_v27  ;;  %698 = vmatprep.subr.bf16.mxu1 %v697_v58  ;;  %v323_v11 = vld [vmem:[#allocation5 + $0xc8] sm:$0xff]  ;;  %v707_v12 = vpack.c.bf16 %v305_v9, %v304_v8  ;;  %v306_v14 = vld [vmem:[#allocation5 + $0x40] sm:$0xff]  ;;  %v324_v16 = vld [vmem:[#allocation5 + $0xd0] sm:$0xff] }
  0x39   :  { %v709_v13 = vpack.c.bf16 %v323_v11, %v322_v10  ;;  %v307_v15 = vld [vmem:[#allocation5 + $0x48] sm:$0xff]  ;;  %v325_v17 = vld [vmem:[#allocation5 + $0xd8] sm:$0xff]  ;;  %v308_v20 = vld [vmem:[#allocation5 + $0x50] sm:$0xff] }
  0x3a   :  { %v711_v18 = vpack.c.bf16 %v307_v15, %v306_v14  ;;  %v713_v19 = vpack.c.bf16 %v325_v17, %v324_v16  ;;  %v309_v21 = vld [vmem:[#allocation5 + $0x58] sm:$0xff]  ;;  %v326_v22 = vld [vmem:[#allocation5 + $0xe0] sm:$0xff]  ;;  %v327_v23 = vld [vmem:[#allocation5 + $0xe8] sm:$0xff] }
  0x3b   :  { %680 = vmatpush1.bf16.msra.mxu0 %v679_v32  ;;  %700 = vmatpush3.bf16.msra.mxu1 %v699_v63  ;;  %v715_v24 = vpack.c.bf16 %v309_v21, %v308_v20  ;;  %v717_v25 = vpack.c.bf16 %v327_v23, %v326_v22  ;;  %v310_v26 = vld [vmem:[#allocation5 + $0x60] sm:$0xff]  ;;  %v311_v27 = vld [vmem:[#allocation5 + $0x68] sm:$0xff]  ;;  %v328_v28 = vld [vmem:[#allocation5 + $0xf0] sm:$0xff] }
  0x3c   :  { %682 = vmatprep.subr.bf16.mxu0 %v681_v33  ;;  %702 = vmatprep.subr.bf16.mxu1 %v701_v1  ;;  %v329_v29 = vld [vmem:[#allocation5 + $0xf8] sm:$0xff]  ;;  %v719_v30 = vpack.c.bf16 %v311_v27, %v310_v26  ;;  %v312_v32 = vld [vmem:[#allocation5 + $0x70] sm:$0xff] }
  0x3d   :  { %v721_v31 = vpack.c.bf16 %v329_v29, %v328_v28  ;;  %v313_v33 = vld [vmem:[#allocation5 + $0x78] sm:$0xff] }
  0x3e   :  { %v723_v34 = vpack.c.bf16 %v313_v33, %v312_v32  ;;  %v224_v33 = vld [vmem:[%s1053_s3] sm:$0x3] }
  0x3f   :  { %684 = vmatpush1.bf16.msra.mxu0 %v683_v38  ;;  %704 = vmatpush3.bf16.msra.mxu1 %v703_v6  ;;  %v100_v38 = vld [vmem:[%s1052_s2] sm:$0x3] }
  0x40   :  { %686 = vmatprep.subr.bf16.mxu0 %v685_v39  ;;  %706 = vmatprep.subr.bf16.mxu1 %v705_v7  ;;  %v946_v39 = vsub.s32 1, %v103_v36  ;;  %v105_v40 = vrot.slane %v100_v38, %v941_v37 }
  0x42   :  { %v109_v41 = vrot.slane %v100_v38, %v946_v39 }
  0x43   :  { %688 = vmatpush1.bf16.msra.mxu0 %v687_v44  ;;  %708 = vmatpush3.bf16.msra.mxu1 %v707_v12 }
  0x44   :  { %690 = vmatprep.subr.bf16.mxu0 %v689_v45  ;;  %710 = vmatprep.subr.bf16.mxu1 %v709_v13 }
  0x47   :  { %692 = vmatpush1.bf16.msra.mxu0 %v691_v48  ;;  %712 = vmatpush3.bf16.msra.mxu1 %v711_v18 }
  0x48   :  { %714 = vmatprep.subr.bf16.mxu1 %v713_v19 }
  0x4a   :  { %177 = vmatmul.mubr.f32.vlgmr.msra.gmra.mrb[0].mxu0 %v67_v49 }
  0x4b   :  { %716 = vmatpush3.bf16.msra.mxu1 %v715_v24  ;;  %658 = vmatprep.mubr.msk.f32.mxu0 %vm851_vm1, %v848_v0 }
  0x4c   :  { %718 = vmatprep.subr.bf16.mxu1 %v717_v25  ;;  %v849_v25 = vmov 1966171168  }
  0x4d   :  { %v233_v26 = vunpack.c.l.s4 %v849_v25 }
  0x4f   :  { %720 = vmatpush3.bf16.msra.mxu1 %v719_v30  ;;  %v234_v27 = vunpack.c.0.s8 %v233_v26 }
  0x50   :  { %722 = vmatprep.subr.bf16.mxu1 %v721_v31 }
  0x51   :  { %v237_v29 = vsub.s32 %v234_v27, %v103_v36 }
  0x53   :  { %724 = vmatpush3.bf16.msra.mxu1 %v723_v34 }
 0x11d   :  { %v178_v42 = vpop.f32.mrb[0].mxu0 }
 0x11e   :  { %v950_v43 = vadd.f32 %v178_v42, %v105_v40  ;;  %v180_v44 = vpop.f32.mrb[1].mxu0 }
 0x11f   :  { %v181_v45 = vadd.f32 %v180_v44, %v109_v41 }
 0x120   :  { %v184_v46 = vsel %vm183_vm0, %v950_v43, 0.0  ;;  %v200_v47 = vmul.f32 %v950_v43, %v950_v43 }
 0x121   :  { %v185_v48 = vrot.slane %v184_v46, 4  ;;  %v191_v49 = vsel %vm183_vm0, %v181_v45, 0.0  ;;  %v201_v50 = vmul.f32 %v181_v45, %v181_v45 }
 0x122   :  { %v202_v51 = vsel %vm183_vm0, %v200_v47, 0.0  ;;  %v192_v52 = vrot.slane %v191_v49, 4 }
 0x123   :  { %v186_v53 = vadd.f32 %v185_v48, %v184_v46  ;;  %v203_v54 = vrot.slane %v202_v51, 4  ;;  %v209_v55 = vsel %vm183_vm0, %v201_v50, 0.0  ;;  %v248_v48 = vld [vmem:[%s1054_s4] sm:$0x3] }
 0x124   :  { %v193_v56 = vadd.f32 %v192_v52, %v191_v49  ;;  %v210_v57 = vrot.slane %v209_v55, 4 }
 0x125   :  { %v187_v58 = vrot.slane %v186_v53, 2  ;;  %v204_v59 = vadd.f32 %v203_v54, %v202_v51 }
 0x126   :  { %v194_v60 = vrot.slane %v193_v56, 2  ;;  %v211_v61 = vadd.f32 %v210_v57, %v209_v55 }
 0x127   :  { %v188_v62 = vadd.f32 %v187_v58, %v186_v53  ;;  %v205_v63 = vrot.slane %v204_v59, 2  ;;  %v850_v58 = vmov 0.0|0.0  }
 0x128   :  { %v195_v1 = vadd.f32 %v194_v60, %v193_v56  ;;  %v212_v2 = vrot.slane %v211_v61, 2  ;;  %725 = vmatprep.subr.bf16.mxu0 %v850_v58 }
 0x129   :  { %v189_v3 = vrot.slane %v188_v62, 1  ;;  %v206_v4 = vadd.f32 %v205_v63, %v204_v59  ;;  %v452_v59 = vld [vmem:[%s1059_s9 + $0x18] sm:$0xff] }
 0x12a   :  { %v196_v5 = vrot.slane %v195_v1, 1  ;;  %v213_v6 = vadd.f32 %v212_v2, %v211_v61  ;;  %v453_v61 = vld [vmem:[%s1059_s9 + $0x20] sm:$0xff]  ;;  %v456_v2 = vld [vmem:[%s1059_s9 + $0x38] sm:$0xff] }
 0x12b   :  { %v190_v7 = vadd.f32 %v189_v3, %v188_v62  ;;  %v207_v8 = vrot.slane %v206_v4, 1  ;;  %v454_v62 = vld [vmem:[%s1059_s9 + $0x28] sm:$0xff] }
 0x12c   :  { %v214_v9 = vrot.slane %v213_v6, 1  ;;  %v197_v10 = vadd.f32 %v196_v5, %v195_v1  ;;  %v732_v63 = vpack.c.bf16 %v454_v62, %v453_v61  ;;  %v455_v1 = vld [vmem:[%s1059_s9 + $0x30] sm:$0xff]  ;;  %v458_v5 = vld [vmem:[%s1059_s9 + $0x48] sm:$0xff] }
 0x12d   :  { %v198_v11 = vmul.f32 0.25, %v190_v7  ;;  %v208_v12 = vadd.f32 %v207_v8, %v206_v4  ;;  %v735_v3 = vpack.c.bf16 %v456_v2, %v455_v1  ;;  %v457_v4 = vld [vmem:[%s1059_s9 + $0x40] sm:$0xff]  ;;  %v459_v7 = vld [vmem:[%s1059_s9 + $0x50] sm:$0xff]  ;;  %v460_v8 = vld [vmem:[%s1059_s9 + $0x58] sm:$0xff] }
 0x12e   :  { %v215_v13 = vadd.f32 %v214_v9, %v213_v6  ;;  %v199_v14 = vmul.f32 0.25, %v197_v10  ;;  %v738_v6 = vpack.c.bf16 %v458_v5, %v457_v4  ;;  %v741_v9 = vpack.c.bf16 %v460_v8, %v459_v7  ;;  %v461_v10 = vld [vmem:[%s1059_s9 + $0x60] sm:$0xff] }
 0x12f   :  { %v216_v15 = vmul.f32 0.25, %v208_v12  ;;  %v218_v16 = vmul.f32 %v198_v11, %v198_v11 }
 0x130   :  { %v217_v17 = vmul.f32 0.25, %v215_v13  ;;  %v219_v18 = vmul.f32 %v199_v14, %v199_v14  ;;  %v463_v13 = vld [vmem:[%s1059_s9 + $0x70] sm:$0xff] }
 0x131   :  { %v220_v19 = vsub.f32 %v216_v15, %v218_v16 }
 0x132   :  { %v221_v20 = vsub.f32 %v217_v17, %v219_v18  ;;  %v572_v17 = vld [vmem:[%s1056_s6] ss:$0 sm:$0xff] }
 0x133   :  { %v222_v21 = vmax.f32 %v220_v19, 0.0 }
 0x134   :  { %v223_v22 = vmax.f32 %v221_v20, 0.0 }
 0x135   :  { %v225_v23 = vadd.f32 1e-05, %v222_v21 }
 0x136   :  { %v226_v24 = vadd.f32 1e-05, %v223_v22 }
 0x137   :  { %760 = vrsqrt.f32 %v225_v23 }
 0x138   :  { %762 = vrsqrt.f32 %v226_v24 }
 0x141   :  { %v761_v28 = vpop.eup %760 }
 0x142   :  { %v763_v30 = vpop.eup %762 }
 0x143   :  { %v231_v31 = vcombine.low %v761_v28, %v763_v30 }
 0x145   :  { %v238_v32 = vrot.slane %v231_v31, %v237_v29 }
 0x147   :  { %v245_v34 = vrot.slane %v238_v32, %v237_v29 }
 0x149   :  { %v247_v35 = vmul.f32 %v245_v34, %v224_v33 }
 0x14b   :  { %v253_v38 = vrot.slane %v247_v35, %v941_v37  ;;  %v257_v40 = vrot.slane %v247_v35, %v946_v39 }
 0x14d   :  { %v260_v41 = vmul.f32 %v253_v38, %v198_v11  ;;  %v261_v42 = vmul.f32 %v257_v40, %v199_v14  ;;  %v282_v44 = vmul.f32 %v257_v40, %v181_v45  ;;  %v281_v46 = vmul.f32 %v253_v38, %v950_v43  ;;  %v449_v43 = vld [vmem:[%s1059_s9] sm:$0xff]  ;;  %v450_v45 = vld [vmem:[%s1059_s9 + $0x8] sm:$0xff]  ;;  %v464_v14 = vld [vmem:[%s1059_s9 + $0x78] sm:$0xff] }
 0x14e   :  { %v726_v57 = vpack.c.bf16 %v450_v45, %v449_v43  ;;  %v462_v11 = vld [vmem:[%s1059_s9 + $0x68] sm:$0xff]  ;;  %v747_v15 = vpack.c.bf16 %v464_v14, %v463_v13 }
 0x14f   :  { %v264_v47 = vcombine.low %v260_v41, %v261_v42  ;;  %v744_v12 = vpack.c.bf16 %v462_v11, %v461_v10 }
 0x150   :  { %727 = vmatpush3.bf16.msra.mxu0 %v726_v57 }
 0x151   :  { %v271_v36 = vrot.slane %v264_v47, %v237_v29  ;;  %728 = vmatprep.subr.bf16.mxu0 %v850_v58 }
 0x153   :  { %v278_v49 = vrot.slane %v271_v36, %v237_v29 }
 0x155   :  { %v280_v50 = vsub.f32 %v248_v48, %v278_v49  ;;  %v431_v48 = vld [vmem:[%s1058_s8] sm:$0x1] }
 0x157   :  { %v291_v51 = vrot.slane %v280_v50, %v946_v39  ;;  %v287_v52 = vrot.slane %v280_v50, %v941_v37  ;;  %v451_v39 = vld [vmem:[%s1059_s9 + $0x10] sm:$0xff] }
 0x158   :  { %v729_v60 = vpack.c.bf16 %v452_v59, %v451_v39 }
 0x159   :  { %v295_v53 = vadd.f32 %v291_v51, %v282_v44  ;;  %v294_v54 = vadd.f32 %v287_v52, %v281_v46  ;;  %v427_v46 = vld [vmem:[%s1057_s7] sm:$0x1]  ;;  %s852_s7 = smov [#allocation7]  }
 0x15a   :  { %730 = vmatpush3.bf16.msra.mxu0 %v729_v60  ;;  %s562_s8 = sshll.u32 %s852_s7, 4  ;;  %s563_s8 = int_to_ptr.vmem [resolvable:$true] %s562_s8 }
 0x15b   :  { %v297_v55 = vmax.f32 %v295_v53, 0.0  ;;  %v296_v56 = vmax.f32 %v294_v54, 0.0  ;;  %731 = vmatprep.subr.bf16.mxu0 %v850_v58  ;;  %p819_p3 = scmp.lt.s32.totalorder %s563_s8, %s563_s8 }
 0x15d   :  { %401 = vmatprep.mubr.f32.mxu1 %v297_v55 }
 0x15e   :  { %402 = vmatmul.mubr.f32.vlgmr.msra.gmra.mrb[0].mxu1 %v296_v56  ;;  %733 = vmatpush3.bf16.msra.mxu0 %v732_v63  ;;  %v573_v56 = vld [vmem:[%s1060_s10] ss:$0 sm:$0xff]  ;;  %s814_s10 = scalar_lea.vmem %s563_s8, 64 }
 0x15f   :  { %734 = vmatprep.subr.bf16.mxu0 %v850_v58  ;;  %p815_p2 = scmp.ne.s32.totalorder %s563_s8, %s814_s10  ;;  %p820_p4 = scmp.lt.s32.totalorder %s814_s10, %s814_s10 }
 0x161   :  { %p821_p5 = por %p820_p4, %p819_p3 }
 0x162   :  { %736 = vmatpush3.bf16.msra.mxu0 %v735_v3 }
 0x163   :  { %737 = vmatprep.subr.bf16.mxu0 %v850_v58  ;;  %p822_p6 = pnand %p821_p5, %p815_p2 }
 0x166   :  { %739 = vmatpush3.bf16.msra.mxu0 %v738_v6 }
 0x167   :  { %740 = vmatprep.subr.bf16.mxu0 %v850_v58 }
 0x16a   :  { %742 = vmatpush3.bf16.msra.mxu0 %v741_v9 }
 0x16b   :  { %743 = vmatprep.subr.bf16.mxu0 %v850_v58 }
 0x16e   :  { %745 = vmatpush3.bf16.msra.mxu0 %v744_v12 }
 0x16f   :  { %746 = vmatprep.subr.bf16.mxu0 %v850_v58 }
 0x172   :  { %748 = vmatpush3.bf16.msra.mxu0 %v747_v15 }
 0x231   :  { %v606_v16 = vpop.f32.mrb[0].mxu1 }
 0x232   :  { %v607_v18 = vpop.f32.mrb[1].mxu1 }
 0x233   :  { %v608_v19 = vadd.f32 %v607_v18, %v606_v16 }
 0x235   :  { %v404_v20 = vadd.f32 %v608_v19, %v572_v17 }
 0x237   :  { %v407_v21 = vsel %vm183_vm0, %v404_v20, 0.0  ;;  %v415_v22 = vmul.f32 %v404_v20, %v404_v20 }
 0x238   :  { %v408_v23 = vrot.slane %v407_v21, 4 }
 0x239   :  { %v416_v24 = vsel %vm183_vm0, %v415_v22, 0.0 }
 0x23a   :  { %v409_v25 = vadd.f32 %v408_v23, %v407_v21  ;;  %v417_v26 = vrot.slane %v416_v24, 4 }
 0x23c   :  { %v410_v27 = vrot.slane %v409_v25, 2  ;;  %v418_v0 = vadd.f32 %v417_v26, %v416_v24 }
 0x23e   :  { %v411_v28 = vadd.f32 %v410_v27, %v409_v25  ;;  %v419_v29 = vrot.slane %v418_v0, 2 }
 0x240   :  { %v412_v30 = vrot.slane %v411_v28, 1  ;;  %v420_v31 = vadd.f32 %v419_v29, %v418_v0 }
 0x242   :  { %v413_v32 = vadd.f32 %v412_v30, %v411_v28  ;;  %v421_v33 = vrot.slane %v420_v31, 1 }
 0x244   :  { %v414_v34 = vmul.f32 0.25, %v413_v32  ;;  %v422_v35 = vadd.f32 %v421_v33, %v420_v31 }
 0x246   :  { %v423_v38 = vmul.f32 0.25, %v422_v35  ;;  %v424_v40 = vmul.f32 %v414_v34, %v414_v34 }
 0x248   :  { %v425_v41 = vsub.f32 %v423_v38, %v424_v40 }
 0x24a   :  { %v426_v42 = vmax.f32 %v425_v41, 0.0 }
 0x24c   :  { %v428_v44 = vadd.f32 1e-05, %v426_v42 }
 0x24e   :  { %764 = vrsqrt.f32 %v428_v44 }
 0x258   :  { %v765_v47 = vpop.eup %764 }
 0x259   :  { %v430_v36 = vmul.f32 %v765_v47, %v427_v46 }
 0x25b   :  { %v432_v49 = vmul.f32 %v430_v36, %v414_v34  ;;  %v438_v50 = vrot.slane %v430_v36, %v941_v37 }
 0x25d   :  { %v433_v51 = vsub.f32 %v431_v48, %v432_v49  ;;  %v440_v52 = vmul.f32 %v438_v50, %v404_v20 }
 0x25f   :  { %v445_v53 = vrot.slane %v433_v51, %v941_v37 }
 0x261   :  { %v447_v54 = vadd.f32 %v445_v53, %v440_v52 }
 0x263   :  { %v448_v55 = vmax.f32 %v447_v54, 0.0 }
 0x265   :  { %659 = vmatmul.mubr.f32.vlgmr.msra.gmra.mrb[2].mxu0 %v448_v55 }
 0x338   :  { %v538_v43 = vpop.f32.mrb[2].mxu0 }
 0x339   :  { %v539_v45 = vadd.f32 %v573_v56, %v538_v43  ;;  %v660_v57 = vpop.f32.mrb[3].mxu0 }
 0x33b   :  { %v543_v58 = vsel %vm542_vm2, %v539_v45, -inf }
 0x33c   :  { %544 = vmax.xlane.f32.xlu0 %v543_v58 }
 0x3c9   :  { %v545_v39 = vpop.xlane.xlu0 %544 }
 0x3ca   :  { %v546_v59 = vsub.f32 %v539_v45, %v545_v39 }
 0x3cc   :  { %v547_v60 = vmul.f32 1.442695, %v546_v59 }
 0x3ce   :  { %766 = vpow2.f32 %v547_v60 }
 0x3d8   :  { %v767_v61 = vpop.eup %766 }
 0x3d9   :  { %v549_v37 = vsel %vm542_vm2, %v767_v61, 0.0 }
 0x3da   :  { %550 = vadd.xlane.f32.xlu0 %v549_v37 }
 0x467   :  { %v551_v62 = vpop.xlane.xlu0 %550 }
 0x468   :  { %768 = vlog2.f32 %v551_v62 }
 0x472   :  { %v769_v63 = vpop.eup %768 }
 0x473   :  { %v553_v1 = vmul.f32 0.6931472, %v769_v63 }
 0x475   :  { %v554_v2 = vsub.f32 %v546_v59, %v553_v1 }
 0x477   :  { %555 = vst.msk [vmem:[#allocation7] sm:$0xf] %vm542_vm2, %v554_v2 }
 0x478   :  { %825 = shalt.err (!%p822_p6)
}
 0x479   :  { %s826_s23 = scalar_lea.hbm %s1061_s11, 64 }
 0x47a   :  { %p827_p7 = scmp.ne.s32.totalorder %s1061_s11, %s826_s23  ;;  %p830_p8 = scmp.lt.u32.totalorder %s826_s23, %s1061_s11 }
 0x47c   :  { %p832_p9 = pnand %p830_p8, %p827_p7 }
 0x47e   :  { %835 = shalt.err (!%p832_p9)
}
 0x47f   :  { %565 = dma.vmem_to_hbm [thread:$0]  %s563_s8, 64, %s1061_s11, [#allocation4]  }
 0x480   :  { %840 = dma.done.wait [#allocation4], 64  }
 0x481   :  { %841 = vsyncadd [#allocation4], 4294967232 }
 0x482   :  { %569 = vsyncpa [#allocation3], 1 }
 0x483   :  { %570 = vsyncpa [#allocation6], 1 }
 0x484   :  { %571 = vsyncpa [#allocation4], 1 }

</bundles_post_ra>
